<compile_context>
chip_gen: v7x
topology: tpu7x:2x2x1
jax: 0.10.0
libtpu: 0.0.40
codegen_flags: <defaults>
</compile_context>

<pallas_src>
import functools
import math

import jax
import jax.numpy as jnp
from jax.experimental import pallas as pl
from jax.experimental.pallas import tpu as pltpu


def _fm_kernel(sc_ref, hu_ref, out_ref):
    # out = hu * S + C   (exact rewrite of 0.5*((hu+S)^2 - hu^2 - Q))
    s = sc_ref[0:1, :]                       # (1, dw) f32
    c = sc_ref[1:2, :]                       # (1, dw) f32
    hu = hu_ref[...].astype(jnp.float32)     # (tile_f, dw)
    out_ref[...] = (hu * s + c).astype(out_ref.dtype)


def _round_up(x, m):
    return ((x + m - 1) // m) * m


@functools.partial(jax.jit, static_argnames=("prior", "target_block_bytes"))
def user_mediator_social_fm(user_degree_embs, hu, user_degree_prior, prior,
                            *, target_block_bytes=2 << 20):
    """JAX/Pallas equivalent of UserMediatorSocialFM.forward."""
    B, D = user_degree_embs.shape
    N, D2 = hu.shape
    assert D == D2

    # ---- tiny (B, D) group reduction in f32, fused in XLA under this jit ----
    if prior:
        prior_vec = jnp.asarray(user_degree_prior, jnp.float32).reshape(B, 1)
    else:
        prior_vec = jnp.full((B, 1), 1.0 / B, dtype=jnp.float32)
    w = user_degree_embs.astype(jnp.float32) * prior_vec        # (B, D)
    s = jnp.sum(w, axis=0, keepdims=True)                       # (1, D)
    q = jnp.sum(w * w, axis=0, keepdims=True)                   # (1, D)
    c = 0.5 * (s * s - q)                                       # (1, D)

    out_dtype = hu.dtype
    itemsize = jnp.dtype(out_dtype).itemsize
    sub = max(8, 32 // itemsize)      # dtype-aware sublane packing: 8/16/32

    # ---- fold rows into the lane axis so the block's last dim is a multiple
    # of 128 (unmasked, lane-dense stores).  dw = lcm(D, 128). ----
    k = 128 // math.gcd(D, 128)       # == lcm(D, 128) // D; k == 1 if 128 | D
    if k > 1 and k * D * sub * itemsize > target_block_bytes:
        k = 1                         # folding would blow the tile budget
    dw = k * D

    pad_rows = (-N) % k               # < k rows; only when N % k != 0
    hu_p = jnp.pad(hu, ((0, pad_rows), (0, 0))) if pad_rows else hu
    n_pad = N + pad_rows
    nf = n_pad // k
    hu_w = hu_p.reshape(nf, dw)       # contiguous row-major reshape (free)

    # Packed replicated operand: row 0 = S, row 1 = C, tiled across the fold.
    sc = jnp.concatenate([jnp.tile(s, (1, k)), jnp.tile(c, (1, k))], axis=0)

    # ---- tile sizing: ~target_block_bytes per hu tile, multiple of `sub`
    # sublanes, but keep >= ~8 grid steps so the pipeline overlaps and both
    # v7x TensorCores get work under dimension_semantics=("parallel",). ----
    row_bytes = dw * itemsize
    tile_f = max(sub, (target_block_bytes // row_bytes) // sub * sub)
    cap = max(sub, _round_up(pl.cdiv(nf, 8), sub))
    tile_f = min(tile_f, cap)
    if tile_f >= nf:
        tile_f = nf                   # single block; full-extent dim is legal
    grid = (pl.cdiv(nf, tile_f),)     # ragged last block is masked by Pallas

    out_w = pl.pallas_call(
        _fm_kernel,
        out_shape=jax.ShapeDtypeStruct((nf, dw), out_dtype),
        grid_spec=pltpu.PrefetchScalarGridSpec(
            num_scalar_prefetch=0,
            grid=grid,
            in_specs=[
                pl.BlockSpec((2, dw), lambda i: (0, 0)),        # packed [S; C]
                pl.BlockSpec((tile_f, dw), lambda i: (i, 0)),   # hu tile
            ],
            out_specs=pl.BlockSpec((tile_f, dw), lambda i: (i, 0)),
        ),
        compiler_params=pltpu.CompilerParams(
            dimension_semantics=("parallel",),
            vmem_limit_bytes=32 << 20,   # keep double-buffering alive on v5e
        ),
    )(sc, hu_w)

    out = out_w.reshape(n_pad, D)
    if pad_rows:
        out = out[:N]                 # only when N % k != 0 (rare path)
    return out


def _reference(user_degree_embs, hu, user_degree_prior, prior):
    """Direct port of the PyTorch forward (concat-and-square form)."""
    B, D = user_degree_embs.shape
    if prior:
        w = user_degree_embs * jnp.asarray(user_degree_prior, jnp.float32).reshape(B, 1)
    else:
        w = user_degree_embs * (1.0 / B)
    conf = jnp.concatenate(
        [hu[:, None, :], jnp.broadcast_to(w[None], (hu.shape[0], B, D))], axis=1
    )
    sum_sqr = jnp.sum(conf, axis=1) ** 2
    sqr_sum = jnp.sum(conf ** 2, axis=1)
    return 0.5 * (sum_sqr - sqr_sum)


if __name__ == "__main__":
    key = jax.random.PRNGKey(0)
    k1, k2, k3 = jax.random.split(key, 3)

    B = 4    # number of user-degree groups
    D = 32   # embedding dim (edim)
    N = 16   # number of users in hu

    user_degree_embs = jax.random.normal(k1, (B, D), dtype=jnp.float32)
    hu = jax.random.normal(k2, (N, D), dtype=jnp.float32)
    # deterministic per-group prior (normalized positive weights), shape (B, 1)
    raw = jnp.abs(jax.random.normal(k3, (B,), dtype=jnp.float32)) + 0.1
    user_degree_prior = (raw / jnp.sum(raw)).reshape(B, 1)

    ok = True

    # f32 path, both prior modes (N % fold == 0: no pad, no slice)
    for prior_flag in (True, False):
        out = jax.block_until_ready(
            user_mediator_social_fm(user_degree_embs, hu, user_degree_prior,
                                    prior=prior_flag))
        ref = _reference(user_degree_embs, hu, user_degree_prior, prior_flag)
        ok = ok and bool(jnp.allclose(out, ref, atol=1e-4, rtol=1e-4))

    # ragged grid / minimal-pad path (N % k != 0) and lcm lane-fold (D = 48)
    for (Nr, Dr) in ((50, 32), (40, 48)):
        ka, kb = jax.random.split(jax.random.PRNGKey(Nr + Dr), 2)
        ude = jax.random.normal(ka, (B, Dr), dtype=jnp.float32)
        hur = jax.random.normal(kb, (Nr, Dr), dtype=jnp.float32)
        out = jax.block_until_ready(
            user_mediator_social_fm(ude, hur, user_degree_prior, prior=True))
        ref = _reference(ude, hur, user_degree_prior, True)
        ok = ok and (out.shape == (Nr, Dr))
        ok = ok and bool(jnp.allclose(out, ref, atol=1e-4, rtol=1e-4))

    # bf16 I/O path (native-dtype DMA in/out, f32 compute inside the kernel)
    hu_bf16 = hu.astype(jnp.bfloat16)
    out_bf16 = jax.block_until_ready(
        user_mediator_social_fm(user_degree_embs, hu_bf16, user_degree_prior,
                                prior=True))
    ref_bf16 = _reference(user_degree_embs, hu_bf16.astype(jnp.float32),
                          user_degree_prior, True)
    ok = ok and (out_bf16.dtype == jnp.bfloat16)
    ok = ok and bool(jnp.allclose(out_bf16.astype(jnp.float32), ref_bf16,
                                  atol=5e-2, rtol=5e-2))

    print("KERNEL_OK" if ok else "KERNEL_MISMATCH")
</pallas_src>

<mosaic_0001>
module attributes {stable_mosaic.version = 11 : i64} {
  func.func @_fm_kernel(%arg0: i32, %arg1: memref<2x128xf32, #tpu.memory_space<vmem>>, %arg2: memref<4x128xf32, #tpu.memory_space<vmem>>, %arg3: memref<4x128xf32, #tpu.memory_space<vmem>>) attributes {dimension_semantics = [#tpu.dimension_semantics<parallel>], iteration_bounds = array<i64: 1>, scalar_prefetch = 0 : i64, scratch_operands = 0 : i64, tpu.core_type = #tpu.core_type<tc>, window_params = [{pipeline_mode = #tpu.pipeline_mode<synchronous>, transform_indices = @transform_0, window_bounds = array<i64: 2, 128>}, {transform_indices = @transform_1, window_bounds = array<i64: 4, 128>}, {transform_indices = @transform_2, window_bounds = array<i64: 4, 128>}]} {
    %c0 = arith.constant 0 : index
    %c0_0 = arith.constant 0 : index
    %0 = vector.load %arg1[%c0, %c0_0] : memref<2x128xf32, #tpu.memory_space<vmem>>, vector<1x128xf32>
    %c1 = arith.constant 1 : index
    %c0_1 = arith.constant 0 : index
    %1 = vector.load %arg1[%c1, %c0_1] : memref<2x128xf32, #tpu.memory_space<vmem>>, vector<1x128xf32>
    %c0_2 = arith.constant 0 : index
    %c0_3 = arith.constant 0 : index
    %2 = vector.load %arg2[%c0_2, %c0_3] : memref<4x128xf32, #tpu.memory_space<vmem>>, vector<4x128xf32>
    %3 = vector.broadcast %0 : vector<1x128xf32> to vector<4x128xf32>
    %4 = arith.mulf %2, %3 : vector<4x128xf32>
    %5 = vector.broadcast %1 : vector<1x128xf32> to vector<4x128xf32>
    %6 = arith.addf %4, %5 : vector<4x128xf32>
    %c0_4 = arith.constant 0 : index
    %c0_5 = arith.constant 0 : index
    %7 = vector.load %arg3[%c0_4, %c0_5] : memref<4x128xf32, #tpu.memory_space<vmem>>, vector<4x128xf32>
    tpu.vector_store %arg3[%c0_4, %c0_5], %6 {strides = array<i32>} : memref<4x128xf32, #tpu.memory_space<vmem>>, vector<4x128xf32>,
    return
  }
  func.func @transform_0(%arg0: i32) -> (i32, i32) {
    %c0_i32 = arith.constant 0 : i32
    %c0_i32_0 = arith.constant 0 : i32
    %c0_i32_1 = arith.constant 0 : i32
    return %c0_i32, %c0_i32_0 : i32, i32
  }
  func.func @transform_1(%arg0: i32) -> (i32, i32) {
    %c0_i32 = arith.constant 0 : i32
    %c0_i32_0 = arith.constant 0 : i32
    return %arg0, %c0_i32 : i32, i32
  }
  func.func @transform_2(%arg0: i32) -> (i32, i32) {
    %c0_i32 = arith.constant 0 : i32
    %c0_i32_0 = arith.constant 0 : i32
    return %arg0, %c0_i32 : i32, i32
  }
}

</mosaic_0001>

<bundles_post_ra>
// kernel: user_mediator_social_fm.1
= control target key start
LH: loop header
LB: loop body
LE: loop exit
PB: predicated region body
PF: predicated region fallthrough
CT: control target
= control target key end

     0   :  { %s58_s0 = inlined_call_operand.vmem [shape: f32[2,128], index: 0, kind: input, shape index: {}]   ;;  %s59_s1 = inlined_call_operand.vmem [shape: f32[4,128], index: 1, kind: input, shape index: {}]   ;;  %s60_s2 = inlined_call_operand.vmem [shape: f32[4,128], index: 2, kind: output, shape index: {}]  }
   0x1   :  { %v29_v0 = vld [vmem:[%s58_s0] ss:$0 sm:$0xff]  ;;  %v30_v1 = vld [vmem:[%s58_s0 + $0x1] ss:$0 sm:$0xff] }
   0x2   :  { %v13_v2 = vld [vmem:[%s59_s1] sm:$0xf] }
   0x3   :  { %v18_v3 = vmul.f32 %v29_v0, %v13_v2 }
   0x5   :  { %v23_v4 = vadd.f32 %v30_v1, %v18_v3 }
   0x7   :  { %24 = vst [vmem:[%s60_s2] sm:$0xf] %v23_v4 }

</bundles_post_ra>
